<compile_context>
chip_gen: v6e
topology: v6e:2x2x1
jax: 0.10.0
libtpu: 0.0.40
codegen_flags: <defaults>
</compile_context>

<pallas_src>
import functools

import jax
import jax.numpy as jnp
from jax.experimental import pallas as pl
from jax.experimental.pallas import tpu as pltpu


# ------------------------------ helpers ------------------------------------ #

def _round_up(x, m):
    return ((x + m - 1) // m) * m


def _pad_2d(a, rows, cols):
    r, c = a.shape
    if r == rows and c == cols:
        return a
    return jnp.pad(a, ((0, rows - r), (0, cols - c)))


def _tile_divisors_desc(dim_padded, cap):
    """Multiple-of-128 divisors of dim_padded (a multiple of 128), <= cap, desc."""
    q = dim_padded // 128
    opts = [128 * d for d in range(1, q + 1) if q % d == 0 and 128 * d <= cap]
    return sorted(opts, reverse=True) or [128]


def _largest_tile(dim_padded, cap):
    return _tile_divisors_desc(dim_padded, cap)[0]


def _vmem_budget_bytes():
    """Generation-aware VMEM cap (~3/4 of per-core VMEM).

    v5e/v6e: 128 MiB physical -> ~96 MiB budget;  v7x: 64 MiB -> ~48 MiB.
    """
    cap = 64 * 1024 * 1024
    try:
        cap = int(pltpu.get_tpu_info().vmem_capacity_bytes)
    except Exception:
        pass
    return max(32 * 1024 * 1024, min((cap * 3) // 4, 100 * 1024 * 1024))


# ------------------------------ kernels ------------------------------------ #

def _mm_step(x_ref, w_ref, mxu_dtype):
    """One K-step of x @ W^T with W in PyTorch (out, in) layout (no HBM transpose)."""
    a = x_ref[...]
    b = w_ref[...]
    if mxu_dtype is not None:
        a = a.astype(mxu_dtype)   # feed the bf16-native MXU; accumulate in f32
        b = b.astype(mxu_dtype)
    # Contract the LAST axis of both operands (implicit W^T).
    # TODO(synk): verify via pl.lower_as_mlir that no per-tile vxpose is emitted
    # for the transposed RHS; if it is, pre-transpose W once upstream instead.
    return jax.lax.dot_general(
        a, b, dimension_numbers=(((1,), (1,)), ((), ())),
        preferred_element_type=jnp.float32)


# ---- plain Linear, f32 output: accumulate directly into o_ref (no scratch) ---- #

def _linear_f32_kernel(x_ref, w_ref, o_ref, *, mxu_dtype):
    @pl.when(pl.program_id(2) == 0)
    def _init():
        o_ref[...] = jnp.zeros_like(o_ref)
    o_ref[...] += _mm_step(x_ref, w_ref, mxu_dtype)


def _linear_f32_bias_kernel(x_ref, w_ref, b_ref, o_ref, *, mxu_dtype):
    @pl.when(pl.program_id(2) == 0)
    def _init():
        o_ref[...] = jnp.zeros_like(o_ref)
    o_ref[...] += _mm_step(x_ref, w_ref, mxu_dtype)

    @pl.when(pl.program_id(2) == pl.num_programs(2) - 1)
    def _finalize():
        o_ref[...] += b_ref[...]


# ---- plain Linear, non-f32 output: f32 scratch accumulator + cast ---- #

def _linear_cast_kernel(x_ref, w_ref, o_ref, acc_ref, *, mxu_dtype):
    @pl.when(pl.program_id(2) == 0)
    def _init():
        acc_ref[...] = jnp.zeros_like(acc_ref)
    acc_ref[...] += _mm_step(x_ref, w_ref, mxu_dtype)

    @pl.when(pl.program_id(2) == pl.num_programs(2) - 1)
    def _finalize():
        o_ref[...] = acc_ref[...].astype(o_ref.dtype)


def _linear_cast_bias_kernel(x_ref, w_ref, b_ref, o_ref, acc_ref, *, mxu_dtype):
    @pl.when(pl.program_id(2) == 0)
    def _init():
        acc_ref[...] = jnp.zeros_like(acc_ref)
    acc_ref[...] += _mm_step(x_ref, w_ref, mxu_dtype)

    @pl.when(pl.program_id(2) == pl.num_programs(2) - 1)
    def _finalize():
        o_ref[...] = (acc_ref[...] + b_ref[...]).astype(o_ref.dtype)


# ---- fused Linear + BatchNorm1d (full batch resident per N-tile) ---- #

def _linear_bn_fused_kernel(x_ref, w_ref, gamma_ref, beta_ref, o_ref, acc_ref, *,
                            eps, inv_b, mxu_dtype):
    k = pl.program_id(1)

    @pl.when(k == 0)
    def _init():
        acc_ref[...] = jnp.zeros_like(acc_ref)

    acc_ref[...] += _mm_step(x_ref, w_ref, mxu_dtype)

    @pl.when(k == pl.num_programs(1) - 1)
    def _finalize():
        y = acc_ref[...]                                          # (B, tn) f32
        mean = jnp.sum(y, axis=0, keepdims=True) * inv_b          # (1, tn)
        yc = y - mean
        var = jnp.sum(yc * yc, axis=0, keepdims=True) * inv_b     # biased var
        scale = jax.lax.rsqrt(var + eps) * gamma_ref[...]         # EUP rsqrt
        o_ref[...] = (yc * scale + beta_ref[...]).astype(o_ref.dtype)


# ---- split BN path (large batch): stats reduction over M, then normalize ---- #

def _bn_stats_kernel(z_ref, gamma_ref, beta_ref, scale_ref, shift_ref,
                     sum_ref, sq_ref, *, inv_b, eps):
    # Padded rows of z are exactly zero (zero-padded x, no bias), so summing the
    # padded block and dividing by the true B gives exact batch statistics.
    mi = pl.program_id(1)

    @pl.when(mi == 0)
    def _init():
        sum_ref[...] = jnp.zeros_like(sum_ref)
        sq_ref[...] = jnp.zeros_like(sq_ref)

    z = z_ref[...]
    sum_ref[...] += jnp.sum(z, axis=0, keepdims=True)
    sq_ref[...] += jnp.sum(z * z, axis=0, keepdims=True)

    @pl.when(mi == pl.num_programs(1) - 1)
    def _finalize():
        mean = sum_ref[...] * inv_b
        # TODO(synk): E[z^2] - mean^2 can lose precision for very large |mean|;
        # a Welford / two-pass centered variance would be more robust.
        var = sq_ref[...] * inv_b - mean * mean
        scale = jax.lax.rsqrt(var + eps) * gamma_ref[...]
        scale_ref[...] = scale
        shift_ref[...] = beta_ref[...] - mean * scale


def _bn_apply_kernel(z_ref, scale_ref, shift_ref, o_ref):
    o_ref[...] = (z_ref[...] * scale_ref[...] + shift_ref[...]).astype(o_ref.dtype)


# ------------------------------ wrappers ------------------------------------ #

def _matmul_padded(xp, wp, bias_p, *, Mp, Np, Kp, tm, tn, tk, out_dtype,
                   mxu_dtype, vmem_limit):
    """Padded x @ W^T (+ bias), M/N/K grid, f32 accumulation across K."""
    grid = (Mp // tm, Np // tn, Kp // tk)
    x_spec = pl.BlockSpec((tm, tk), lambda i, j, k: (i, k))
    w_spec = pl.BlockSpec((tn, tk), lambda i, j, k: (j, k))   # PyTorch layout
    o_spec = pl.BlockSpec((tm, tn), lambda i, j, k: (i, j))
    b_spec = pl.BlockSpec((1, tn), lambda i, j, k: (0, j))

    has_bias = bias_p is not None
    direct = jnp.dtype(out_dtype) == jnp.dtype(jnp.float32)

    if direct:
        kernel = _linear_f32_bias_kernel if has_bias else _linear_f32_kernel
        scratch = []
    else:
        kernel = _linear_cast_bias_kernel if has_bias else _linear_cast_kernel
        scratch = [pltpu.VMEM((tm, tn), jnp.float32)]

    in_specs = [x_spec, w_spec] + ([b_spec] if has_bias else [])
    args = (xp, wp) + ((bias_p,) if has_bias else ())

    return pl.pallas_call(
        functools.partial(kernel, mxu_dtype=mxu_dtype),
        out_shape=jax.ShapeDtypeStruct((Mp, Np), out_dtype),
        grid_spec=pltpu.PrefetchScalarGridSpec(
            num_scalar_prefetch=0,
            grid=grid,
            in_specs=in_specs,
            out_specs=o_spec,
            scratch_shapes=scratch),
        compiler_params=pltpu.CompilerParams(
            dimension_semantics=("parallel", "parallel", "arbitrary"),
            vmem_limit_bytes=vmem_limit),
        cost_estimate=pl.CostEstimate(
            flops=2 * Mp * Np * Kp,
            transcendentals=0,
            bytes_accessed=4 * (Mp * Kp + Np * Kp + Mp * Np + Np)),
    )(*args)


def _plain_linear_padded(x, w, bias, out_dtype, mxu_dtype, budget):
    """Returns (padded output (Mp, Np), Mp, Np, tm, tn)."""
    B, cin = x.shape
    cout = w.shape[0]
    Np = _round_up(cout, 128)
    Kp = _round_up(cin, 128)

    # M tile: whole batch in one tile for small B, else minimize padded rows.
    if B <= 512:
        tm = max(16, _round_up(B, 16))     # 16: bf16 sublane packing for MXU feed
        Mp = tm
    else:
        best = None
        for c in (512, 448, 384, 320, 256, 192, 128):
            key = (_round_up(B, c) - B, -c)
            if best is None or key < best[0]:
                best = (key, c)
        tm = best[1]
        Mp = _round_up(B, tm)

    itemsize_out = jnp.dtype(out_dtype).itemsize
    has_bias = bias is not None
    direct = jnp.dtype(out_dtype) == jnp.dtype(jnp.float32)

    def footprint(tn_, tk_):
        f = 2 * (tm * tk_ + tn_ * tk_) * 4 + 2 * tm * tn_ * itemsize_out
        if has_bias:
            f += 2 * tn_ * 4
        if not direct:
            f += tm * tn_ * 4
        return f

    tn_opts = _tile_divisors_desc(Np, 512)
    tk_opts = _tile_divisors_desc(Kp, 2048)
    tn, tk = tn_opts[-1], tk_opts[-1]
    done = False
    for tn_c in tn_opts:                       # shrink K first, then N
        for tk_c in tk_opts:
            if footprint(tn_c, tk_c) <= budget:
                tn, tk = tn_c, tk_c
                done = True
                break
        if done:
            break

    # Give both v7x TensorCores a parallel tile when the grid would collapse.
    if Mp // tm == 1 and Np // tn == 1 and Np >= 256:
        tn = _largest_tile(Np, Np // 2)

    xp = _pad_2d(x, Mp, Kp)
    wp = _pad_2d(w, Np, Kp)
    bp = _pad_2d(bias.reshape(1, cout), 1, Np) if has_bias else None

    out = _matmul_padded(xp, wp, bp, Mp=Mp, Np=Np, Kp=Kp, tm=tm, tn=tn, tk=tk,
                         out_dtype=out_dtype, mxu_dtype=mxu_dtype,
                         vmem_limit=budget)
    return out, Mp, Np, tm, tn


def _bn_split(x, w, gamma, beta, eps, out_dtype, mxu_dtype, budget):
    """Large-batch BN: matmul -> per-feature stats reduced over M -> normalize."""
    B, _ = x.shape
    cout = w.shape[0]
    z, Mp, Np, tm, tn = _plain_linear_padded(x, w, None, jnp.float32,
                                             mxu_dtype, budget)
    gp = _pad_2d(gamma.reshape(1, cout), 1, Np)
    bp = _pad_2d(beta.reshape(1, cout), 1, Np)

    scale, shift = pl.pallas_call(
        functools.partial(_bn_stats_kernel, inv_b=1.0 / B, eps=eps),
        out_shape=(jax.ShapeDtypeStruct((1, Np), jnp.float32),
                   jax.ShapeDtypeStruct((1, Np), jnp.float32)),
        grid_spec=pltpu.PrefetchScalarGridSpec(
            num_scalar_prefetch=0,
            grid=(Np // tn, Mp // tm),
            in_specs=[
                pl.BlockSpec((tm, tn), lambda j, i: (i, j)),
                pl.BlockSpec((1, tn), lambda j, i: (0, j)),
                pl.BlockSpec((1, tn), lambda j, i: (0, j)),
            ],
            out_specs=(pl.BlockSpec((1, tn), lambda j, i: (0, j)),
                       pl.BlockSpec((1, tn), lambda j, i: (0, j))),
            scratch_shapes=[pltpu.VMEM((1, tn), jnp.float32),
                            pltpu.VMEM((1, tn), jnp.float32)]),
        compiler_params=pltpu.CompilerParams(
            dimension_semantics=("parallel", "arbitrary"),
            vmem_limit_bytes=budget),
        cost_estimate=pl.CostEstimate(
            flops=3 * Mp * Np, transcendentals=Np,
            bytes_accessed=4 * (Mp * Np + 4 * Np)),
    )(z, gp, bp)

    out = pl.pallas_call(
        _bn_apply_kernel,
        out_shape=jax.ShapeDtypeStruct((Mp, Np), out_dtype),
        grid_spec=pltpu.PrefetchScalarGridSpec(
            num_scalar_prefetch=0,
            grid=(Mp // tm, Np // tn),
            in_specs=[
                pl.BlockSpec((tm, tn), lambda i, j: (i, j)),
                pl.BlockSpec((1, tn), lambda i, j: (0, j)),
                pl.BlockSpec((1, tn), lambda i, j: (0, j)),
            ],
            out_specs=pl.BlockSpec((tm, tn), lambda i, j: (i, j))),
        compiler_params=pltpu.CompilerParams(
            dimension_semantics=("parallel", "parallel"),
            vmem_limit_bytes=budget),
        cost_estimate=pl.CostEstimate(
            flops=2 * Mp * Np, transcendentals=0,
            bytes_accessed=4 * (2 * Mp * Np + 2 * Np)),
    )(z, scale, shift)

    if (Mp, Np) != (B, cout):
        out = out[:B, :cout]
    return out


def _bn_path(x, w, gamma, beta, eps, out_dtype, mxu_dtype, budget, force_split):
    B, cin = x.shape
    cout = w.shape[0]
    Np = _round_up(cout, 128)
    Kp = _round_up(cin, 128)
    itemsize_out = jnp.dtype(out_dtype).itemsize

    def footprint(tn_, tk_):   # x(2) + W(2) + gamma/beta(2+2) + out(2) + acc(1)
        return (2 * B * tk_ * 4 + 2 * tn_ * tk_ * 4 + 4 * tn_ * 4
                + 2 * B * tn_ * itemsize_out + B * tn_ * 4)

    tn_opts = _tile_divisors_desc(Np, 512)
    tk_opts = _tile_divisors_desc(Kp, 2048)
    chosen = None
    if not force_split:
        for tn_c in tn_opts:                   # shrink K first, then N
            for tk_c in tk_opts:
                if footprint(tn_c, tk_c) <= budget:
                    chosen = (tn_c, tk_c)
                    break
            if chosen:
                break

    if chosen is None:
        # Batch too large for a full-batch-resident accumulator: split reduction.
        return _bn_split(x, w, gamma, beta, eps, out_dtype, mxu_dtype, budget)

    tn, tk = chosen
    if Np // tn == 1 and Np >= 256:            # both v7x TCs get an N tile
        tn2 = _largest_tile(Np, Np // 2)
        if footprint(tn2, tk) <= budget:
            tn = tn2

    xp = _pad_2d(x, B, Kp)
    wp = _pad_2d(w, Np, Kp)
    gp = _pad_2d(gamma.reshape(1, cout), 1, Np)
    bp = _pad_2d(beta.reshape(1, cout), 1, Np)

    out = pl.pallas_call(
        functools.partial(_linear_bn_fused_kernel, eps=eps, inv_b=1.0 / B,
                          mxu_dtype=mxu_dtype),
        out_shape=jax.ShapeDtypeStruct((B, Np), out_dtype),
        grid_spec=pltpu.PrefetchScalarGridSpec(
            num_scalar_prefetch=0,
            grid=(Np // tn, Kp // tk),
            in_specs=[
                pl.BlockSpec((B, tk), lambda j, k: (0, k)),    # x (full batch)
                pl.BlockSpec((tn, tk), lambda j, k: (j, k)),   # W (out, in)
                pl.BlockSpec((1, tn), lambda j, k: (0, j)),    # gamma
                pl.BlockSpec((1, tn), lambda j, k: (0, j)),    # beta
            ],
            out_specs=pl.BlockSpec((B, tn), lambda j, k: (0, j)),
            scratch_shapes=[pltpu.VMEM((B, tn), jnp.float32)]),
        compiler_params=pltpu.CompilerParams(
            dimension_semantics=("parallel", "arbitrary"),
            vmem_limit_bytes=budget),
        cost_estimate=pl.CostEstimate(
            flops=2 * B * Np * Kp,
            transcendentals=Np,
            bytes_accessed=4 * (B * Kp + Np * Kp + B * Np + 2 * Np)),
    )(xp, wp, gp, bp)
    return out[:, :cout] if Np != cout else out


def linear_layer(x, params, *, use_bias=True, use_bn=False, eps=1e-5,
                 mxu_dtype=jnp.bfloat16, bn_force_split=False):
    """Forward pass of LinearLayer.

    x:         (B, in_features)
    params:    'weight' (out_features, in_features) [PyTorch layout], plus
               'bias' or 'gamma'/'beta' depending on the config.
    mxu_dtype: dtype fed to the MXU (bf16 default; None = keep input dtype,
               bit-faithful to an f32 reference).
    """
    B, _ = x.shape
    w = params["weight"]
    cout = w.shape[0]
    out_dtype = x.dtype
    budget = _vmem_budget_bytes()

    if use_bn:   # nn.Linear(bias=False) then BatchNorm1d (training-mode stats)
        return _bn_path(x, w, params["gamma"], params["beta"], eps, out_dtype,
                        mxu_dtype, budget, force_split=bn_force_split)

    bias = params["bias"] if use_bias else None
    out, Mp, Np, _, _ = _plain_linear_padded(x, w, bias, out_dtype, mxu_dtype,
                                             budget)
    if (Mp, Np) != (B, cout):
        out = out[:B, :cout]
    return out


# -------------------------------- demo -------------------------------------- #

def _init_linear_params(key, in_features, out_features, with_bias):
    """Deterministic init matching nn.Linear default (uniform +-1/sqrt(fan_in))."""
    kw, kb = jax.random.split(key)
    bound = 1.0 / jnp.sqrt(jnp.float32(in_features))
    weight = jax.random.uniform(
        kw, (out_features, in_features), jnp.float32, -bound, bound)
    params = {"weight": weight}
    if with_bias:
        params["bias"] = jax.random.uniform(
            kb, (out_features,), jnp.float32, -bound, bound)
    return params


def _bn_ref(x, params, eps=1e-5):
    z = x @ params["weight"].T
    mu = z.mean(0, keepdims=True)
    var = ((z - mu) ** 2).mean(0, keepdims=True)
    return (z - mu) / jnp.sqrt(var + eps) * params["gamma"] + params["beta"]


if __name__ == "__main__":
    key = jax.random.PRNGKey(0)
    k_x, k_p, k_x2, k_p2, k_x3 = jax.random.split(key, 5)

    B, IN, OUT = 8, 32, 128
    x = jax.random.normal(k_x, (B, IN), jnp.float32)
    params = _init_linear_params(k_p, IN, OUT, with_bias=True)
    y_ref = x @ params["weight"].T + params["bias"]

    # --- config 1: defaults (bias, no BN), exact f32 MXU feed ---
    y = jax.block_until_ready(linear_layer(x, params, mxu_dtype=None))
    assert jnp.allclose(y, y_ref, atol=1e-4, rtol=1e-4)

    # --- config 1b: same, default bf16 MXU feed (looser tolerance) ---
    y_bf = jax.block_until_ready(linear_layer(x, params))
    assert jnp.allclose(y_bf, y_ref, atol=5e-2, rtol=5e-2)

    # --- config 2: use_bias=False, use_bn=False ---
    params_nb = _init_linear_params(k_p, IN, OUT, with_bias=False)
    y_nb = jax.block_until_ready(
        linear_layer(x, params_nb, use_bias=False, mxu_dtype=None))
    assert jnp.allclose(y_nb, x @ params_nb["weight"].T, atol=1e-4, rtol=1e-4)

    # --- config 3: use_bn=True (fused Linear + BatchNorm1d training mode) ---
    params_bn = _init_linear_params(k_p, IN, OUT, with_bias=False)
    params_bn["gamma"] = jnp.ones((OUT,), jnp.float32)
    params_bn["beta"] = jnp.zeros((OUT,), jnp.float32)
    y_bn = jax.block_until_ready(
        linear_layer(x, params_bn, use_bn=True, mxu_dtype=None))
    assert jnp.allclose(y_bn, _bn_ref(x, params_bn), atol=1e-4, rtol=1e-4)

    # --- config 3b: BN with bf16 MXU feed at a slightly larger batch ---
    x3 = jax.random.normal(k_x3, (64, IN), jnp.float32)
    y_bn_bf = jax.block_until_ready(linear_layer(x3, params_bn, use_bn=True))
    assert jnp.allclose(y_bn_bf, _bn_ref(x3, params_bn), atol=1e-1, rtol=1e-1)

    # --- config 3c: forced split BN path (large-batch fallback), exact ---
    y_bn_sp = jax.block_until_ready(
        linear_layer(x, params_bn, use_bn=True, mxu_dtype=None,
                     bn_force_split=True))
    assert jnp.allclose(y_bn_sp, _bn_ref(x, params_bn), atol=1e-4, rtol=1e-4)

    # --- config 4: ragged (non-128-multiple) features exercise padding ---
    B2, IN2, OUT2 = 8, 40, 200
    x2 = jax.random.normal(k_x2, (B2, IN2), jnp.float32)
    params2 = _init_linear_params(k_p2, IN2, OUT2, with_bias=True)
    y2 = jax.block_until_ready(linear_layer(x2, params2, mxu_dtype=None))
    y2_ref = x2 @ params2["weight"].T + params2["bias"]
    assert jnp.allclose(y2, y2_ref, atol=1e-4, rtol=1e-4)

    print("KERNEL_OK")
</pallas_src>

<mosaic_0001>
module attributes {stable_mosaic.version = 11 : i64} {
  func.func @_linear_f32_bias_kernel(%arg0: i32, %arg1: i32, %arg2: i32, %arg3: memref<16x128xf32, #tpu.memory_space<vmem>>, %arg4: memref<128x128xf32, #tpu.memory_space<vmem>>, %arg5: memref<1x128xf32, #tpu.memory_space<vmem>>, %arg6: memref<16x128xf32, #tpu.memory_space<vmem>>) attributes {dimension_semantics = [#tpu.dimension_semantics<parallel>, #tpu.dimension_semantics<parallel>, #tpu.dimension_semantics<arbitrary>], iteration_bounds = array<i64: 1, 1, 1>, scalar_prefetch = 0 : i64, scratch_operands = 0 : i64, tpu.core_type = #tpu.core_type<tc>, window_params = [{transform_indices = @transform_0, window_bounds = array<i64: 16, 128>}, {transform_indices = @transform_1, window_bounds = array<i64: 128, 128>}, {transform_indices = @transform_2, window_bounds = array<i64: 1, 128>}, {transform_indices = @transform_3, window_bounds = array<i64: 16, 128>}]} {
    %c0_i32 = arith.constant 0 : i32
    %0 = arith.cmpi eq, %arg2, %c0_i32 : i32
    %1 = arith.extui %0 : i1 to i32
    %c0_i32_0 = arith.constant 0 : i32
    %2 = arith.cmpi ne, %1, %c0_i32_0 : i32
    scf.if %2 {
      %cst_10 = arith.constant 0.000000e+00 : f32
      %12 = vector.broadcast %cst_10 : f32 to vector<16x128xf32>
      %c0_11 = arith.constant 0 : index
      %c0_12 = arith.constant 0 : index
      %13 = vector.load %arg6[%c0_11, %c0_12] : memref<16x128xf32, #tpu.memory_space<vmem>>, vector<16x128xf32>
      tpu.vector_store %arg6[%c0_11, %c0_12], %12 {strides = array<i32>} : memref<16x128xf32, #tpu.memory_space<vmem>>, vector<16x128xf32>,
    } else {
    }
    %c0 = arith.constant 0 : index
    %c0_1 = arith.constant 0 : index
    %3 = vector.load %arg6[%c0, %c0_1] : memref<16x128xf32, #tpu.memory_space<vmem>>, vector<16x128xf32>
    %c0_2 = arith.constant 0 : index
    %c0_3 = arith.constant 0 : index
    %4 = vector.load %arg3[%c0_2, %c0_3] : memref<16x128xf32, #tpu.memory_space<vmem>>, vector<16x128xf32>
    %c0_4 = arith.constant 0 : index
    %c0_5 = arith.constant 0 : index
    %5 = vector.load %arg4[%c0_4, %c0_5] : memref<128x128xf32, #tpu.memory_space<vmem>>, vector<128x128xf32>
    %cst = arith.constant dense<0.000000e+00> : vector<16x128xf32>
    %6 = tpu.matmul %4, %5, %cst {dimension_numbers = #tpu.dot_dimension_numbers<[1], [1], [0], [0], [0, 0, 1, 0], [], []>} : vector<16x128xf32>, vector<128x128xf32>, vector<16x128xf32> -> vector<16x128xf32>
    %7 = arith.addf %3, %6 : vector<16x128xf32>
    %c0_6 = arith.constant 0 : index
    %c0_7 = arith.constant 0 : index
    %8 = vector.load %arg6[%c0_6, %c0_7] : memref<16x128xf32, #tpu.memory_space<vmem>>, vector<16x128xf32>
    tpu.vector_store %arg6[%c0_6, %c0_7], %7 {strides = array<i32>} : memref<16x128xf32, #tpu.memory_space<vmem>>, vector<16x128xf32>,
    %c0_i32_8 = arith.constant 0 : i32
    %9 = arith.cmpi eq, %arg2, %c0_i32_8 : i32
    %10 = arith.extui %9 : i1 to i32
    %c0_i32_9 = arith.constant 0 : i32
    %11 = arith.cmpi ne, %10, %c0_i32_9 : i32
    scf.if %11 {
      %c0_10 = arith.constant 0 : index
      %c0_11 = arith.constant 0 : index
      %12 = vector.load %arg6[%c0_10, %c0_11] : memref<16x128xf32, #tpu.memory_space<vmem>>, vector<16x128xf32>
      %c0_12 = arith.constant 0 : index
      %c0_13 = arith.constant 0 : index
      %13 = vector.load %arg5[%c0_12, %c0_13] : memref<1x128xf32, #tpu.memory_space<vmem>>, vector<1x128xf32>
      %14 = vector.broadcast %13 : vector<1x128xf32> to vector<16x128xf32>
      %15 = arith.addf %12, %14 : vector<16x128xf32>
      %c0_14 = arith.constant 0 : index
      %c0_15 = arith.constant 0 : index
      %16 = vector.load %arg6[%c0_14, %c0_15] : memref<16x128xf32, #tpu.memory_space<vmem>>, vector<16x128xf32>
      tpu.vector_store %arg6[%c0_14, %c0_15], %15 {strides = array<i32>} : memref<16x128xf32, #tpu.memory_space<vmem>>, vector<16x128xf32>,
    } else {
    }
    return
  }
  func.func @transform_0(%arg0: i32, %arg1: i32, %arg2: i32) -> (i32, i32) {
    %c0_i32 = arith.constant 0 : i32
    return %arg0, %arg2 : i32, i32
  }
  func.func @transform_1(%arg0: i32, %arg1: i32, %arg2: i32) -> (i32, i32) {
    %c0_i32 = arith.constant 0 : i32
    return %arg1, %arg2 : i32, i32
  }
  func.func @transform_2(%arg0: i32, %arg1: i32, %arg2: i32) -> (i32, i32) {
    %c0_i32 = arith.constant 0 : i32
    %c0_i32_0 = arith.constant 0 : i32
    return %c0_i32, %arg1 : i32, i32
  }
  func.func @transform_3(%arg0: i32, %arg1: i32, %arg2: i32) -> (i32, i32) {
    %c0_i32 = arith.constant 0 : i32
    return %arg0, %arg1 : i32, i32
  }
}

</mosaic_0001>

<bundles_post_ra>
// kernel: tpu_custom_call.1
= control target key start
LH: loop header
LB: loop body
LE: loop exit
PB: predicated region body
PF: predicated region fallthrough
CT: control target
= control target key end

     0   :  { %8 = vsyncpa [#allocation3], 0  ;;  %s354_s0 = inlined_call_operand.hbm [shape: f32[16,128], index: 0, kind: input, shape index: {}]   ;;  %s355_s1 = inlined_call_operand.hbm [shape: f32[128,128], index: 1, kind: input, shape index: {}]   ;;  %s356_s2 = inlined_call_operand.vmem [shape: f32[1,128], index: 2, kind: input, shape index: {}]   ;;  %s357_s3 = inlined_call_operand.hbm [shape: f32[16,128], index: 3, kind: output, shape index: {}]  }
   0x1   :  { %9 = vsyncpa [#allocation6], 0 }
   0x2   :  { %10 = vsyncpa [#allocation4], 0  ;;  %s308_s12 = smov [#allocation2]  }
   0x3   :  { %s16_s13 = sshll.u32 %s308_s12, 4  ;;  %s17_s13 = int_to_ptr.vmem [resolvable:$true] %s16_s13 }
   0x4   :  { %s250_s14 = scalar_lea.vmem %s17_s13, 256  ;;  %p255_p1 = scmp.lt.s32.totalorder %s17_s13, %s17_s13 }
   0x5   :  { %p251_p0 = scmp.ne.s32.totalorder %s17_s13, %s250_s14  ;;  %p256_p2 = scmp.lt.s32.totalorder %s250_s14, %s250_s14 }
   0x7   :  { %p257_p3 = por %p256_p2, %p255_p1 }
   0x9   :  { %p258_p4 = pnand %p257_p3, %p251_p0 }
   0xb   :  { %261 = shalt.err (!%p258_p4)
}
   0xc   :  { %s309_s15 = smov 128   ;;  %s310_s16 = smov 8  }
   0xd   :  { %22 = dma.hbm_to_vmem [thread:$0]  %s354_s0, 256, %s17_s13, [#allocation3], %s309_s15, %s309_s15, %s310_s16  }
   0xe   :  { %s311_s19 = smov [#allocation5]  }
   0xf   :  { %s28_s20 = sshll.u32 %s311_s19, 4  ;;  %s29_s20 = int_to_ptr.vmem [resolvable:$true] %s28_s20 }
  0x10   :  { %s270_s21 = scalar_lea.vmem %s29_s20, 2048  ;;  %p275_p6 = scmp.lt.s32.totalorder %s29_s20, %s29_s20 }
  0x11   :  { %p271_p5 = scmp.ne.s32.totalorder %s29_s20, %s270_s21  ;;  %p276_p7 = scmp.lt.s32.totalorder %s270_s21, %s270_s21 }
  0x13   :  { %p277_p8 = por %p276_p7, %p275_p6 }
  0x15   :  { %p278_p9 = pnand %p277_p8, %p271_p5 }
  0x17   :  { %281 = shalt.err (!%p278_p9)
}
  0x18   :  { %34 = dma.hbm_to_vmem [thread:$0]  %s355_s1, 2048, %s29_s20, [#allocation6], %s309_s15, %s309_s15, %s310_s16  }
  0x19   :  { %302 = dma.done.wait [#allocation3], 256  }
  0x1a   :  { %303 = vsyncadd [#allocation3], 4294967040 }
  0x1b   :  { %304 = dma.done.wait [#allocation6], 2048  }
  0x1c   :  { %305 = vsyncadd [#allocation6], 4294965248  ;;  %v68_v0 = vld [vmem:[#allocation5 + $0x78] sm:$0xff]  ;;  %v67_v1 = vld [vmem:[#allocation5 + $0x70] sm:$0xff]  ;;  %s312_s24 = smov [#allocation7]  }
  0x1d   :  { %201 = vmatprep.subr.mxu0 %v68_v0  ;;  %v66_v2 = vld [vmem:[#allocation5 + $0x68] sm:$0xff]  ;;  %v51_v3 = vld [vmem:[#allocation2] sm:$0xff]  ;;  %v65_v4 = vld [vmem:[#allocation5 + $0x60] sm:$0xff]  ;;  %s169_s25 = sshll.u32 %s312_s24, 4  ;;  %s170_s25 = int_to_ptr.vmem [resolvable:$true] %s169_s25 }
  0x1e   :  { %202 = vmatpush3.xpose.msra.mxu0 %v68_v0  ;;  %233 = vmatprep.mubr.f32.mxu0 %v51_v3  ;;  %v64_v5 = vld [vmem:[#allocation5 + $0x58] sm:$0xff]  ;;  %v63_v6 = vld [vmem:[#allocation5 + $0x50] sm:$0xff]  ;;  %v62_v7 = vld [vmem:[#allocation5 + $0x48] sm:$0xff]  ;;  %s282_s26 = scalar_lea.vmem %s170_s25, 256  ;;  %p287_p11 = scmp.lt.s32.totalorder %s170_s25, %s170_s25 }
  0x1f   :  { %203 = vmatprep.subr.mxu0 %v67_v1  ;;  %v61_v8 = vld [vmem:[#allocation5 + $0x40] sm:$0xff]  ;;  %v60_v9 = vld [vmem:[#allocation5 + $0x38] sm:$0xff]  ;;  %v59_v10 = vld [vmem:[#allocation5 + $0x30] sm:$0xff]  ;;  %p283_p10 = scmp.ne.s32.totalorder %s170_s25, %s282_s26  ;;  %p288_p12 = scmp.lt.s32.totalorder %s282_s26, %s282_s26 }
  0x20   :  { %v58_v11 = vld [vmem:[#allocation5 + $0x28] sm:$0xff]  ;;  %v57_v12 = vld [vmem:[#allocation5 + $0x20] sm:$0xff]  ;;  %v56_v13 = vld [vmem:[#allocation5 + $0x18] sm:$0xff] }
  0x21   :  { %v55_v14 = vld [vmem:[#allocation5 + $0x10] sm:$0xff]  ;;  %v54_v15 = vld [vmem:[#allocation5 + $0x8] sm:$0xff]  ;;  %v53_v16 = vld [vmem:[#allocation5] sm:$0xff]  ;;  %p289_p13 = por %p288_p12, %p287_p11 }
  0x22   :  { %204 = vmatpush3.xpose.msra.mxu0 %v67_v1  ;;  %v52_v17 = vld [vmem:[#allocation2 + $0x8] sm:$0xff]  ;;  %v182_v19 = vld [vmem:[%s356_s2] ss:$0 sm:$0xff] }
  0x23   :  { %205 = vmatprep.subr.mxu0 %v66_v2  ;;  %p290_p0 = pnand %p289_p13, %p283_p10 }
  0x26   :  { %206 = vmatpush3.xpose.msra.mxu0 %v66_v2 }
  0x27   :  { %207 = vmatprep.subr.mxu0 %v65_v4 }
  0x2a   :  { %208 = vmatpush3.xpose.msra.mxu0 %v65_v4 }
  0x2b   :  { %209 = vmatprep.subr.mxu0 %v64_v5 }
  0x2e   :  { %210 = vmatpush3.xpose.msra.mxu0 %v64_v5 }
  0x2f   :  { %211 = vmatprep.subr.mxu0 %v63_v6 }
  0x32   :  { %212 = vmatpush3.xpose.msra.mxu0 %v63_v6 }
  0x33   :  { %213 = vmatprep.subr.mxu0 %v62_v7 }
  0x36   :  { %214 = vmatpush3.xpose.msra.mxu0 %v62_v7 }
  0x37   :  { %215 = vmatprep.subr.mxu0 %v61_v8 }
  0x3a   :  { %216 = vmatpush3.xpose.msra.mxu0 %v61_v8 }
  0x3b   :  { %217 = vmatprep.subr.mxu0 %v60_v9 }
  0x3e   :  { %218 = vmatpush3.xpose.msra.mxu0 %v60_v9 }
  0x3f   :  { %219 = vmatprep.subr.mxu0 %v59_v10 }
  0x42   :  { %220 = vmatpush3.xpose.msra.mxu0 %v59_v10 }
  0x43   :  { %221 = vmatprep.subr.mxu0 %v58_v11 }
  0x46   :  { %222 = vmatpush3.xpose.msra.mxu0 %v58_v11 }
  0x47   :  { %223 = vmatprep.subr.mxu0 %v57_v12 }
  0x4a   :  { %224 = vmatpush3.xpose.msra.mxu0 %v57_v12 }
  0x4b   :  { %225 = vmatprep.subr.mxu0 %v56_v13 }
  0x4e   :  { %226 = vmatpush3.xpose.msra.mxu0 %v56_v13 }
  0x4f   :  { %227 = vmatprep.subr.mxu0 %v55_v14 }
  0x52   :  { %228 = vmatpush3.xpose.msra.mxu0 %v55_v14 }
  0x53   :  { %229 = vmatprep.subr.mxu0 %v54_v15 }
  0x56   :  { %230 = vmatpush3.xpose.msra.mxu0 %v54_v15 }
  0x57   :  { %231 = vmatprep.subr.mxu0 %v53_v16 }
  0x5a   :  { %232 = vmatpush3.xpose.msra.mxu0 %v53_v16 }
  0x5d   :  { %234 = vmatmul.mubr.f32.vlgmr.msra.gmra.mxu0 %v52_v17 }
 0x11d   :  { %v235_v18 = vpop.f32.mrf.mxu0 }
 0x11e   :  { %v161_v21 = vadd.f32 %v235_v18, %v182_v19 }
 0x11f   :  { %v135_v20 = vpop.f32.mrf.mxu0 }
 0x120   :  { %v160_v22 = vadd.f32 %v182_v19, %v135_v20  ;;  %163 = vst [vmem:[#allocation7 + $0x8] sm:$0xff] %v161_v21 }
 0x122   :  { %162 = vst [vmem:[#allocation7] sm:$0xff] %v160_v22 }
 0x123   :  { %293 = shalt.err (!%p290_p0)
}
 0x124   :  { %175 = dma.vmem_to_hbm [thread:$0]  %s170_s25, 256, %s357_s3, [#allocation4], %s309_s15, %s309_s15, %s310_s16  }
 0x125   :  { %306 = dma.done.wait [#allocation4], 256  }
 0x126   :  { %307 = vsyncadd [#allocation4], 4294967040 }
 0x127   :  { %179 = vsyncpa [#allocation3], 1 }
 0x128   :  { %180 = vsyncpa [#allocation6], 1 }
 0x129   :  { %181 = vsyncpa [#allocation4], 1 }

</bundles_post_ra>
